<compile_context>
chip_gen: v6e
topology: v6e:2x2x1
jax: 0.10.0
libtpu: 0.0.40
codegen_flags: <defaults>
</compile_context>

<pallas_src>
import functools

import jax
import jax.numpy as jnp
from jax.experimental import pallas as pl
from jax.experimental.pallas import tpu as pltpu

_MiB = 1024 * 1024
_LANE_CANDIDATES = (2048, 1024, 512, 256, 128)   # widest-first, all %128 == 0
_SINGLE_BLOCK_BYTES = 1 * _MiB                   # below this, one block is fine


def _swish_kernel(x_ref, o_ref, *, compute_f32):
    # swish(x) = x * sigmoid(x) = 0.5 * x * (1 + tanh(x/2)):
    # one EUP transcendental + VALU muls; stays HBM-bound at v7x element rates.
    x = x_ref[...]
    if compute_f32:
        x = x.astype(jnp.float32)
    o_ref[...] = (0.5 * x * (1.0 + jnp.tanh(0.5 * x))).astype(o_ref.dtype)


def _device_kind() -> str:
    try:
        return jax.devices()[0].device_kind.lower()
    except Exception:
        return ""


@functools.lru_cache(maxsize=None)
def _chip_params():
    """Returns (target_block_bytes, vmem_cap_bytes, native_bf16_ok)."""
    kind = _device_kind()
    if "v7" in kind:
        # v7x: 64 MiB per-TC VMEM, 3.2 TB/s HBM -> bigger blocks, tight cap.
        return 8 * _MiB, 48 * _MiB, True
    if "v6" in kind:
        return 12 * _MiB, 96 * _MiB, True
    if "v5e" in kind or ("v5" in kind and "lite" in kind):
        return 12 * _MiB, 96 * _MiB, False   # v5e: no bf16 VPU/EUP -> f32 compute
    # Unknown / older generations: proven-safe conservative defaults.
    return 4 * _MiB, 64 * _MiB, False


def _round_down(x, m):
    return (x // m) * m


def _round_up(x, m):
    return ((x + m - 1) // m) * m


def _swish_2d(x2d, tile_rows, vmem_limit, compute_f32):
    rows, lane = x2d.shape
    kernel = functools.partial(_swish_kernel, compute_f32=compute_f32)
    return pl.pallas_call(
        kernel,
        out_shape=jax.ShapeDtypeStruct(x2d.shape, x2d.dtype),
        grid_spec=pltpu.PrefetchScalarGridSpec(
            num_scalar_prefetch=0,
            grid=(pl.cdiv(rows, tile_rows),),
            in_specs=[pl.BlockSpec((tile_rows, lane), lambda i: (i, 0))],
            out_specs=pl.BlockSpec((tile_rows, lane), lambda i: (i, 0)),
        ),
        compiler_params=pltpu.CompilerParams(
            dimension_semantics=("parallel",),
            vmem_limit_bytes=vmem_limit,
        ),
    )(x2d)


def _swish_flat_aligned(x_flat, dtype):
    """Swish on a flat array whose size is a positive multiple of 128."""
    n = x_flat.size
    itemsize = jnp.dtype(dtype).itemsize
    sublane = {4: 8, 2: 16, 1: 32}.get(itemsize, 8)

    target_block_bytes, vmem_cap, native_bf16 = _chip_params()
    compute_f32 = not (dtype == jnp.bfloat16 and native_bf16)

    # Widest lane count that evenly divides n -> zero-copy reshape, lane-dense
    # unmasked stores.
    lane = next(c for c in _LANE_CANDIDATES if n % c == 0)
    rows = n // lane
    x2d = x_flat.reshape(rows, lane)

    row_bytes = lane * itemsize
    total_bytes = rows * row_bytes

    if rows <= sublane or total_bytes <= _SINGLE_BLOCK_BYTES:
        # Tiny slab: one full-extent block (always a legal block shape).
        tile_rows = rows
    else:
        tile_rows = min(rows, max(sublane, target_block_bytes // row_bytes))
        tile_rows = max(sublane, _round_down(tile_rows, sublane))
        if tile_rows >= rows:
            # Guarantee >= 2 grid steps so "parallel" sharding can use both
            # TensorCores on v7x instead of leaving one idle.
            tile_rows = max(sublane, _round_up(pl.cdiv(rows, 2), sublane))
        # Prefer an even step count so neither core gets a spare block.
        steps = pl.cdiv(rows, tile_rows)
        if steps > 1 and steps % 2 == 1:
            cand = max(sublane, _round_up(pl.cdiv(rows, steps + 1), sublane))
            if pl.cdiv(rows, cand) % 2 == 0:
                tile_rows = cand

    block_bytes = tile_rows * row_bytes
    # Double-buffered input + output blocks (4x) plus headroom, capped below
    # the physical per-core VMEM of the detected generation.
    vmem_limit = int(min(vmem_cap, max(16 * _MiB, 6 * block_bytes)))

    out2d = _swish_2d(x2d, tile_rows, vmem_limit, compute_f32)
    return out2d.reshape(-1)


def swish(x: jax.Array) -> jax.Array:
    """Elementwise swish. Accepts any shape / dtype; NCHW layout is irrelevant."""
    orig_shape = x.shape
    dtype = x.dtype
    n = x.size
    if n == 0:
        return x

    x_flat = x.reshape(-1)
    n_main = _round_down(n, 128)

    if n_main == n:
        # Fast path: size is a multiple of 128 -> whole array through the kernel.
        out_flat = _swish_flat_aligned(x_flat, dtype)
    elif n_main == 0:
        # Fewer than 128 elements: not worth a kernel launch; plain XLA.
        xf = x_flat.astype(jnp.float32)
        out_flat = (xf * jax.nn.sigmoid(xf)).astype(dtype)
    else:
        # Ragged size: kernel on the 128-aligned prefix, tiny XLA tail.
        # Avoids the full-array pad + slice (2 extra HBM passes) of before.
        out_main = _swish_flat_aligned(x_flat[:n_main], dtype)
        tail = x_flat[n_main:].astype(jnp.float32)
        out_tail = (tail * jax.nn.sigmoid(tail)).astype(dtype)
        out_flat = jnp.concatenate([out_main, out_tail])

    return out_flat.reshape(orig_shape)


def swish_ref(x):
    return x * jax.nn.sigmoid(x)


if __name__ == "__main__":
    key = jax.random.PRNGKey(0)
    # NCHW input, small shape consistent with typical conv activations.
    x = jax.random.normal(key, (2, 4, 16, 16), dtype=jnp.float32)
    out = jax.block_until_ready(swish(x))
    ref = swish_ref(x)
    assert out.shape == x.shape and out.dtype == x.dtype
    assert jnp.allclose(out, ref, atol=1e-5, rtol=1e-5)

    # Extra coverage: multi-row fast path, ragged fallback, bf16.
    k1, k2, k3 = jax.random.split(key, 3)

    x_big = jax.random.normal(k1, (2, 64, 64, 64), dtype=jnp.float32)
    out_big = jax.block_until_ready(swish(x_big))
    assert jnp.allclose(out_big, swish_ref(x_big), atol=1e-5, rtol=1e-5)

    x_odd = jax.random.normal(k2, (3, 5, 7, 11), dtype=jnp.float32)
    out_odd = jax.block_until_ready(swish(x_odd))
    assert jnp.allclose(out_odd, swish_ref(x_odd), atol=1e-5, rtol=1e-5)

    x_bf16 = jax.random.normal(k3, (2, 4, 16, 16), dtype=jnp.bfloat16)
    out_bf16 = jax.block_until_ready(swish(x_bf16))
    assert out_bf16.dtype == jnp.bfloat16
    assert jnp.allclose(
        out_bf16.astype(jnp.float32),
        swish_ref(x_bf16.astype(jnp.float32)),
        atol=2e-2, rtol=2e-2,
    )

    print("KERNEL_OK")
</pallas_src>

<mosaic_0001>
module attributes {stable_mosaic.version = 11 : i64} {
  func.func @_swish_kernel(%arg0: i32, %arg1: memref<1x2048xf32, #tpu.memory_space<vmem>>, %arg2: memref<1x2048xf32, #tpu.memory_space<vmem>>) attributes {dimension_semantics = [#tpu.dimension_semantics<parallel>], iteration_bounds = array<i64: 1>, scalar_prefetch = 0 : i64, scratch_operands = 0 : i64, tpu.core_type = #tpu.core_type<tc>, window_params = [{transform_indices = @transform_0, window_bounds = array<i64: 1, 2048>}, {transform_indices = @transform_1, window_bounds = array<i64: 1, 2048>}]} {
    %c0 = arith.constant 0 : index
    %c0_0 = arith.constant 0 : index
    %0 = vector.load %arg1[%c0, %c0_0] : memref<1x2048xf32, #tpu.memory_space<vmem>>, vector<1x2048xf32>
    %cst = arith.constant 5.000000e-01 : f32
    %1 = vector.broadcast %cst : f32 to vector<1x2048xf32>
    %2 = arith.mulf %1, %0 : vector<1x2048xf32>
    %cst_1 = arith.constant 5.000000e-01 : f32
    %3 = vector.broadcast %cst_1 : f32 to vector<1x2048xf32>
    %4 = arith.mulf %3, %0 : vector<1x2048xf32>
    %5 = math.tanh %4 : vector<1x2048xf32>
    %cst_2 = arith.constant 1.000000e+00 : f32
    %6 = vector.broadcast %cst_2 : f32 to vector<1x2048xf32>
    %7 = arith.addf %6, %5 : vector<1x2048xf32>
    %8 = arith.mulf %2, %7 : vector<1x2048xf32>
    %c0_3 = arith.constant 0 : index
    %c0_4 = arith.constant 0 : index
    %9 = vector.load %arg2[%c0_3, %c0_4] : memref<1x2048xf32, #tpu.memory_space<vmem>>, vector<1x2048xf32>
    tpu.vector_store %arg2[%c0_3, %c0_4], %8 {strides = array<i32>} : memref<1x2048xf32, #tpu.memory_space<vmem>>, vector<1x2048xf32>,
    return
  }
  func.func @transform_0(%arg0: i32) -> (i32, i32) {
    %c0_i32 = arith.constant 0 : i32
    %c0_i32_0 = arith.constant 0 : i32
    return %arg0, %c0_i32 : i32, i32
  }
  func.func @transform_1(%arg0: i32) -> (i32, i32) {
    %c0_i32 = arith.constant 0 : i32
    %c0_i32_0 = arith.constant 0 : i32
    return %arg0, %c0_i32 : i32, i32
  }
}

</mosaic_0001>

<bundles_post_ra>
// kernel: tpu_custom_call.1
= control target key start
LH: loop header
LB: loop body
LE: loop exit
PB: predicated region body
PF: predicated region fallthrough
CT: control target
= control target key end

     0   :  { %6 = vsyncpa [#allocation3], 0  ;;  %s116_s0 = inlined_call_operand.hbm [shape: f32[1,2048], index: 0, kind: input, shape index: {}]   ;;  %s117_s1 = inlined_call_operand.hbm [shape: f32[1,2048], index: 1, kind: output, shape index: {}]  }
   0x1   :  { %7 = vsyncpa [#allocation4], 0  ;;  %s98_s6 = smov [#allocation2]  }
   0x2   :  { %s14_s7 = sshll.u32 %s98_s6, 4  ;;  %s15_s7 = int_to_ptr.vmem [resolvable:$true] %s14_s7 }
   0x3   :  { %s62_s8 = scalar_lea.vmem %s15_s7, 256  ;;  %p67_p1 = scmp.lt.s32.totalorder %s15_s7, %s15_s7 }
   0x4   :  { %p63_p0 = scmp.ne.s32.totalorder %s15_s7, %s62_s8  ;;  %p68_p2 = scmp.lt.s32.totalorder %s62_s8, %s62_s8 }
   0x6   :  { %p69_p3 = por %p68_p2, %p67_p1 }
   0x8   :  { %p70_p4 = pnand %p69_p3, %p63_p0 }
   0xa   :  { %73 = shalt.err (!%p70_p4)
}
   0xb   :  { %17 = dma.hbm_to_vmem [thread:$0]  %s116_s0, 256, %s15_s7, [#allocation3]  }
   0xc   :  { %94 = dma.done.wait [#allocation3], 256  }
   0xd   :  { %95 = vsyncadd [#allocation3], 4294967040  ;;  %v21_v0 = vld [vmem:[#allocation2] sm:$0xff]  ;;  %v22_v1 = vld [vmem:[#allocation2 + $0x8] sm:$0xff]  ;;  %s99_s11 = smov [#allocation5]  }
   0xe   :  { %v23_v2 = vmul.f32 0.5, %v21_v0  ;;  %v24_v3 = vmul.f32 0.5, %v22_v1  ;;  %s39_s12 = sshll.u32 %s99_s11, 4  ;;  %s40_s12 = int_to_ptr.vmem [resolvable:$true] %s39_s12 }
   0xf   :  { %s74_s0 = scalar_lea.vmem %s40_s12, 256  ;;  %p79_p6 = scmp.lt.s32.totalorder %s40_s12, %s40_s12 }
  0x10   :  { %50 = vtanh.f32 %v23_v2  ;;  %p75_p5 = scmp.ne.s32.totalorder %s40_s12, %s74_s0  ;;  %p80_p7 = scmp.lt.s32.totalorder %s74_s0, %s74_s0 }
  0x11   :  { %52 = vtanh.f32 %v24_v3 }
  0x12   :  { %p81_p8 = por %p80_p7, %p79_p6 }
  0x14   :  { %p82_p9 = pnand %p81_p8, %p75_p5 }
  0x1d   :  { %v51_v4 = vpop.eup %50 }
  0x1e   :  { %v53_v5 = vpop.eup %52  ;;  %v27_v6 = vadd.f32 1.0, %v51_v4 }
  0x1f   :  { %v28_v7 = vadd.f32 1.0, %v53_v5 }
  0x20   :  { %v29_v8 = vmul.f32 %v27_v6, %v23_v2 }
  0x21   :  { %v30_v9 = vmul.f32 %v28_v7, %v24_v3 }
  0x22   :  { %31 = vst [vmem:[#allocation5] sm:$0xff] %v29_v8 }
  0x23   :  { %32 = vst [vmem:[#allocation5 + $0x8] sm:$0xff] %v30_v9 }
  0x24   :  { %85 = shalt.err (!%p82_p9)
}
  0x25   :  { %42 = dma.vmem_to_hbm [thread:$0]  %s40_s12, 256, %s117_s1, [#allocation4]  }
  0x26   :  { %96 = dma.done.wait [#allocation4], 256  }
  0x27   :  { %97 = vsyncadd [#allocation4], 4294967040 }
  0x28   :  { %46 = vsyncpa [#allocation3], 1 }
  0x29   :  { %47 = vsyncpa [#allocation4], 1 }

</bundles_post_ra>
